<compile_context>
chip_gen: v7x
topology: tpu7x:2x2x1
jax: 0.10.0
libtpu: 0.0.40
codegen_flags: <defaults>
</compile_context>

<pallas_src>
import functools

import jax
import jax.numpy as jnp
from jax.experimental import pallas as pl
from jax.experimental.pallas import tpu as pltpu


def _layernorm_kernel(x_ref, g_ref, o_ref, *, eps, inv_c):
    # x_ref: (C, TILE_S)   g_ref: (C, 1)   o_ref: (C, TILE_S)
    x = x_ref[...].astype(jnp.float32)
    mean = jnp.sum(x, axis=0, keepdims=True) * inv_c          # (1, TILE_S)
    ex2 = jnp.sum(x * x, axis=0, keepdims=True) * inv_c       # (1, TILE_S)
    var = ex2 - mean * mean                                   # unbiased=False
    inv = jax.lax.rsqrt(var + eps)                            # EUP, free slot
    gamma = g_ref[...].astype(jnp.float32)                    # (C, 1) broadcasts
    o_ref[...] = ((x - mean) * inv * gamma).astype(o_ref.dtype)


def _pick_tile_s(S, C, itemsize, max_block_bytes=2 * 1024 * 1024):
    """Largest divisor of S that is a multiple of 128 and keeps one (C, TILE_S)
    block <= max_block_bytes. Falls back to the full extent if S is not a
    multiple of 128 (full-extent blocks always satisfy the (8,128) rule)."""
    if S % 128 != 0:
        return S
    best = 128
    t = 128
    while t <= S:
        if S % t == 0 and C * t * itemsize <= max_block_bytes:
            best = t
        t += 128
    return best


def layernorm(x, gamma):
    """x: (B, C, F, H, W); gamma: (1, C, 1, 1, 1). Returns same shape/dtype as x."""
    B, C, F, H, W = x.shape
    # Match the PyTorch module: eps depends on dtype.
    eps = 1e-05 if x.dtype == jnp.float32 else 1e-03

    S = F * H * W
    # Free, contiguous reshape: C stays at dim 1, no transpose in HBM.
    x3 = x.reshape(B, C, S)
    gamma2d = gamma.reshape(C, 1).astype(jnp.float32)

    itemsize = jnp.dtype(x.dtype).itemsize
    tile_s = _pick_tile_s(S, C, itemsize)
    grid = (B, S // tile_s)

    kernel = functools.partial(_layernorm_kernel, eps=eps, inv_c=1.0 / C)

    numel = B * C * S
    cost = pl.CostEstimate(
        flops=7 * numel,                 # x*x, two column sums, sub, two muls
        transcendentals=B * S,           # one rsqrt per spatial column
        bytes_accessed=2 * x.size * itemsize + gamma2d.size * 4,
    )

    out3 = pl.pallas_call(
        kernel,
        out_shape=jax.ShapeDtypeStruct((B, C, S), x.dtype),
        grid_spec=pltpu.PrefetchScalarGridSpec(
            num_scalar_prefetch=0,
            grid=grid,
            in_specs=[
                # squeeze the batch dim; kernel sees a lane-dense (C, TILE_S) tile
                pl.BlockSpec((None, C, tile_s), lambda b, s: (b, 0, s)),
                pl.BlockSpec((C, 1), lambda b, s: (0, 0)),
            ],
            out_specs=pl.BlockSpec((None, C, tile_s), lambda b, s: (b, 0, s)),
        ),
        compiler_params=pltpu.CompilerParams(
            # Both axes are independent -> shard across TensorCores on v7x;
            # no-op on single-core v5e/v6e.
            dimension_semantics=("parallel", "parallel"),
            # Blocks are <= 2 MiB, so 2 (double-buffer) x (in + out) <= 8 MiB;
            # 32 MiB is safe on every generation (v5e default scoped is 16 MiB).
            vmem_limit_bytes=32 * 1024 * 1024,
        ),
        cost_estimate=cost,
    )(x3, gamma2d)

    return out3.reshape(B, C, F, H, W)


def layernorm_ref(x, gamma):
    xf = x.astype(jnp.float32)
    eps = 1e-05 if x.dtype == jnp.float32 else 1e-03
    mean = jnp.mean(xf, axis=1, keepdims=True)
    var = jnp.mean((xf - mean) ** 2, axis=1, keepdims=True)
    return ((xf - mean) / jnp.sqrt(var + eps) * gamma.astype(jnp.float32)).astype(x.dtype)


if __name__ == "__main__":
    key = jax.random.PRNGKey(0)
    B, C, F, H, W = 2, 4, 4, 16, 16
    x = jax.random.normal(key, (B, C, F, H, W), dtype=jnp.float32)
    # Deterministic parameter init matching nn.Parameter(torch.ones(1, dim, 1, 1, 1))
    gamma = jnp.ones((1, C, 1, 1, 1), dtype=jnp.float32)

    out = layernorm(x, gamma)
    out = jax.block_until_ready(out)

    ref = layernorm_ref(x, gamma)
    assert out.shape == x.shape and out.dtype == x.dtype
    assert jnp.allclose(out, ref, atol=1e-5, rtol=1e-5)
    print("KERNEL_OK")
</pallas_src>

<mosaic_0001>
module attributes {stable_mosaic.version = 11 : i64} {
  func.func @_layernorm_kernel(%arg0: i32, %arg1: i32, %arg2: memref<1x4x1024xf32, #tpu.memory_space<vmem>>, %arg3: memref<4x1xf32, #tpu.memory_space<vmem>>, %arg4: memref<1x4x1024xf32, #tpu.memory_space<vmem>>) attributes {dimension_semantics = [#tpu.dimension_semantics<parallel>, #tpu.dimension_semantics<parallel>], iteration_bounds = array<i64: 2, 1>, scalar_prefetch = 0 : i64, scratch_operands = 0 : i64, tpu.core_type = #tpu.core_type<tc>, window_params = [{transform_indices = @transform_0, window_bounds = array<i64: 1, 4, 1024>}, {pipeline_mode = #tpu.pipeline_mode<synchronous>, transform_indices = @transform_1, window_bounds = array<i64: 4, 1>}, {transform_indices = @transform_2, window_bounds = array<i64: 1, 4, 1024>}]} {
    %c0 = arith.constant 0 : index
    %c0_0 = arith.constant 0 : index
    %c0_1 = arith.constant 0 : index
    %0 = vector.load %arg2[%c0, %c0_0, %c0_1] : memref<1x4x1024xf32, #tpu.memory_space<vmem>>, vector<1x4x1024xf32>
    %1 = vector.shape_cast %0 : vector<1x4x1024xf32> to vector<4x1024xf32>
    %cst = arith.constant dense<0.000000e+00> : vector<1024xf32>
    %2 = vector.multi_reduction <add>, %1, %cst [0] : vector<4x1024xf32> to vector<1024xf32>
    %3 = vector.shape_cast %2 : vector<1024xf32> to vector<1x1024xf32>
    %cst_2 = arith.constant 2.500000e-01 : f32
    %4 = vector.broadcast %cst_2 : f32 to vector<1x1024xf32>
    %5 = arith.mulf %3, %4 : vector<1x1024xf32>
    %6 = arith.mulf %1, %1 : vector<4x1024xf32>
    %cst_3 = arith.constant dense<0.000000e+00> : vector<1024xf32>
    %7 = vector.multi_reduction <add>, %6, %cst_3 [0] : vector<4x1024xf32> to vector<1024xf32>
    %8 = vector.shape_cast %7 : vector<1024xf32> to vector<1x1024xf32>
    %cst_4 = arith.constant 2.500000e-01 : f32
    %9 = vector.broadcast %cst_4 : f32 to vector<1x1024xf32>
    %10 = arith.mulf %8, %9 : vector<1x1024xf32>
    %11 = arith.mulf %5, %5 : vector<1x1024xf32>
    %12 = arith.subf %10, %11 : vector<1x1024xf32>
    %cst_5 = arith.constant 9.99999974E-6 : f32
    %13 = vector.broadcast %cst_5 : f32 to vector<1x1024xf32>
    %14 = arith.addf %12, %13 : vector<1x1024xf32>
    %15 = math.rsqrt %14 : vector<1x1024xf32>
    %c0_6 = arith.constant 0 : index
    %c0_7 = arith.constant 0 : index
    %16 = vector.load %arg3[%c0_6, %c0_7] : memref<4x1xf32, #tpu.memory_space<vmem>>, vector<4x1xf32>
    %17 = vector.broadcast %5 : vector<1x1024xf32> to vector<4x1024xf32>
    %18 = arith.subf %1, %17 : vector<4x1024xf32>
    %19 = vector.broadcast %15 : vector<1x1024xf32> to vector<4x1024xf32>
    %20 = arith.mulf %18, %19 : vector<4x1024xf32>
    %21 = vector.broadcast %16 : vector<4x1xf32> to vector<4x1024xf32>
    %22 = arith.mulf %20, %21 : vector<4x1024xf32>
    %c0_8 = arith.constant 0 : index
    %c0_9 = arith.constant 0 : index
    %c0_10 = arith.constant 0 : index
    %23 = vector.load %arg4[%c0_8, %c0_9, %c0_10] : memref<1x4x1024xf32, #tpu.memory_space<vmem>>, vector<1x4x1024xf32>
    %24 = vector.shape_cast %23 : vector<1x4x1024xf32> to vector<4x1024xf32>
    %25 = vector.shape_cast %22 : vector<4x1024xf32> to vector<1x4x1024xf32>
    tpu.vector_store %arg4[%c0_8, %c0_9, %c0_10], %25 {strides = array<i32>} : memref<1x4x1024xf32, #tpu.memory_space<vmem>>, vector<1x4x1024xf32>,
    return
  }
  func.func @transform_0(%arg0: i32, %arg1: i32) -> (i32, i32, i32) {
    %c0_i32 = arith.constant 0 : i32
    %c0_i32_0 = arith.constant 0 : i32
    return %arg0, %c0_i32, %arg1 : i32, i32, i32
  }
  func.func @transform_1(%arg0: i32, %arg1: i32) -> (i32, i32) {
    %c0_i32 = arith.constant 0 : i32
    %c0_i32_0 = arith.constant 0 : i32
    %c0_i32_1 = arith.constant 0 : i32
    return %c0_i32, %c0_i32_0 : i32, i32
  }
  func.func @transform_2(%arg0: i32, %arg1: i32) -> (i32, i32, i32) {
    %c0_i32 = arith.constant 0 : i32
    %c0_i32_0 = arith.constant 0 : i32
    return %arg0, %c0_i32, %arg1 : i32, i32, i32
  }
}

</mosaic_0001>

<bundles_post_ra>
// kernel: tpu_custom_call.1
= control target key start
LH: loop header
LB: loop body
LE: loop exit
PB: predicated region body
PF: predicated region fallthrough
CT: control target
= control target key end

     0   :  { %7 = vsyncpa [#allocation3], 0  ;;  %s1027_s0 = inlined_call_operand.hbm [shape: f32[2,4,1024], index: 0, kind: input, shape index: {}]   ;;  %s1028_s1 = inlined_call_operand.vmem [shape: f32[4,1], index: 1, kind: input, shape index: {}]   ;;  %s1029_s2 = inlined_call_operand.hbm [shape: f32[2,4,1024], index: 2, kind: output, shape index: {}]  }
   0x1   :  { %9 = vsyncpa [#allocation3 + $0x1], 0 }
   0x2   :  { %10 = vsyncpa [#allocation4], 0 }
   0x3   :  { %12 = vsyncpa [#allocation4 + $0x1], 0  ;;  %s770_s9 = smov 0   ;;  %s772_s10 = smov 0  }
   0x4   :  { %s774_s11 = smov 0   ;;  %s776_s12 = smov 0  }
   0x5   :  { %s778_s13 = smov 0   ;;  %s780_s14 = smov 0  }
   0x6 LB: > { %s535_s15 = sadd.s32 4294967295, %s749_s14   ;;  %s536_s16 = sadd.s32 4294967294, %s749_s14   ;;  %s749_s14 = sphi %s780_s14, %s18_s14   ;;  %s745_s13 = sphi %s778_s13, %s1045_s13   ;;  %s741_s12 = sphi %s776_s12, %s1044_s12   ;;  %s737_s11 = sphi %s774_s11, %s1043_s11   ;;  %s733_s10 = sphi %s772_s10, %s1042_s10   ;;  %s729_s9 = sphi %s770_s9, %s1041_s9  }
   0x7   : > { %s30_s17 = sadd.s32 1, %s745_s13  ;;  %s39_s18 = sadd.s32 1, %s737_s11 }
   0x8   : > { %p32_p0 = scmp.ge.s32.totalorder %s30_s17, 2  ;;  %p46_p1 = scmp.ne.s32.totalorder %s737_s11, %s733_s10 }
   0x9   : > { %p47_p2 = scmp.eq.s32.totalorder %s749_s14, 0  ;;  %p52_p3 = scmp.ne.s32.totalorder %s733_s10, %s729_s9 }
   0xa   : > { %s1047_s17 = smov (%p32_p0, %s30_s17), 0  ;;  %p53_p5 = scmp.eq.s32.totalorder %s535_s15, 0 }
   0xb   : > { %p811_p4 = por %p47_p2, %p46_p1  ;;  %s34_s20 = ssub.s32 %s745_s13, %s1047_s17 }
   0xc   : > { %p99_p6 = scmp.eq.s32.totalorder %s535_s15, 1  ;;  %p37_p7 = scmp.eq.s32.totalorder %s34_s20, 0 }
   0xd   : > { %p817_p8 = por %p53_p5, %p52_p3  ;;  %p105_p10 = scmp.eq.s32.totalorder %s536_s16, 1 }
   0xe   : > { %p821_p9 = por %p99_p6, %p46_p1  ;;  %p564_p13 = scmp.lt.s32.totalorder %s749_s14, 2 }
   0xf   : > { %s826_s23 = scalar_select %p37_p7, %s737_s11, %s39_s18  }
  0x10   : > { %s1033_s22 = scalar_select %p821_p9, 1, 0 }
  0x11   : > { %p828_p11 = por %p105_p10, %p52_p3  ;;  %s128_s25 = sand.u32 1, %s737_s11  }
  0x12   : > { %s539_s26 = sshll.u32 %s128_s25, 5  ;;  %s550_s27 = sshll.u32 %s745_s13, 9 }
  0x13   : > { %s1034_s24 = scalar_select %p828_p11, 1, 0 }
  0x14   : > { %s839_s30 = scalar_lea.hbm %s1027_s0, %s550_s27  ;;  %s132_s3 = scalar_lea.vmem [#allocation2], %s539_s26 }
  0x15   : > { %s142_s4 = sshll.u32 %s132_s3, 4  ;;  %p845_p0 = pnand %p564_p13, %p811_p4  ;;  %s841_s4 = int_to_ptr.vmem [resolvable:$true] %s142_s4 }
  0x16   : > { %s129_s6 = scalar_lea.sflag [#allocation3], %s128_s25  ;;  %s637_s7 = scalar_lea.hbm %s839_s30, 512 }
  0x17   : > { %p638_p3 = scmp.ne.s32.totalorder %s839_s30, %s637_s7  ;;  %p639_p5 = pneg %p845_p0 }
  0x18   : > { %s642_s16 = scalar_lea.hbm %s1027_s0, 1024  ;;  %p643_p4 = scmp.lt.u32.totalorder %s839_s30, %s1027_s0 }
  0x19   : > { %p640_p6 = pnand %p639_p5, %p638_p3  ;;  %p644_p10 = scmp.lt.u32.totalorder %s642_s16, %s637_s7 }
  0x1a   : > { %p646_p12 = scmp.lt.u32.totalorder %s637_s7, %s839_s30 }
  0x1b   : > { %p641_p7 = pneg %p640_p6  ;;  %p645_p13 = por %p644_p10, %p643_p4 }
  0x1d   : > { %p647_p1 = por %p646_p12, %p645_p13 }
  0x1f   : > { %p648_p2 = pnand %p647_p1, %p641_p7 }
  0x21   : > { %651 = shalt.err (!%p648_p2)
}
  0x22   : > { %s652_s20 = scalar_lea.vmem %s841_s4, 512  ;;  %s751_s25 = smov [#allocation2]  }
  0x23   : > { %p653_p3 = scmp.ne.s32.totalorder %s841_s4, %s652_s20  ;;  %s657_s26 = sshll.u32 %s751_s25, 4  ;;  %s658_s26 = int_to_ptr.vmem [resolvable:$false] %s657_s26 }
  0x24   : > { %s659_s27 = scalar_lea.vmem %s658_s26, 1024  ;;  %p660_p9 = scmp.lt.s32.totalorder %s841_s4, %s658_s26 }
  0x25   : > { %p655_p6 = pnand %p653_p3, %p639_p5  ;;  %p661_p4 = scmp.lt.s32.totalorder %s659_s27, %s652_s20 }
  0x27   : > { %p656_p11 = pneg %p655_p6  ;;  %p662_p10 = por %p661_p4, %p660_p9 }
  0x29   : > { %p663_p12 = pnand %p662_p10, %p656_p11 }
  0x2b   : > { %666 = shalt.err (!%p663_p12)
}
  0x2c   : > { %559 = dma.hbm_to_vmem [thread:$0]  (!%p845_p0), %s839_s30, 512, %s841_s4, %s129_s6  }
  0x2d   : > { %p1036_p1 = scmp.lt.s32.totalorder %s749_s14, 3  ;;  %p1037_p2 = scmp.ge.s32.totalorder %s749_s14, 1 }
  0x2f   : > { %p148_p5 = pnand %p1037_p2, %p1036_p1 }
  0x30   : > { %s881_s28 = sand.u32 (!%p148_p5), 1, %s733_s10  }
  0x31   : > { %151 = sbr.rel (%p148_p5) target bundleno = 206 (0xce), region = 28  ;;  %s543_s29 = sshll.u32 (!%p148_p5), %s881_s28, 5 }
  0x32   : > { %s154_s3 = scalar_lea.sflag (!%p148_p5), [#allocation3], %s881_s28  ;;  %s157_s5 = scalar_lea.vmem (!%p148_p5), [#allocation2], %s543_s29 }
  0x38   : > { %720 = dma.done.wait (%p817_p8), %s154_s3, 512  }
  0x39   : > { %722 = vsyncadd (%p817_p8), %s154_s3, 4294966784  ;;  %v752_v0 = vmov 0   ;;  %v373_v1 = vld [vmem:[%s1028_s1] sm:$0xf]  ;;  %vm196_vm0 = vcmask 1043456   ;;  %v896_v3 = vld [vmem:[%s157_s5 + $0x8] sm:$0xff] }
  0x3a   : > { %616 = vset.pattern.permute.xlu0 %v752_v0  ;;  %v894_v2 = vld [vmem:[%s157_s5] sm:$0xff]  ;;  %v898_v4 = vld [vmem:[%s157_s5 + $0x10] sm:$0xff]  ;;  %v906_v8 = vld [vmem:[%s157_s5 + $0x18] sm:$0xff]  ;;  %v189_v9 = vcombine.high %v896_v3, %v896_v3  ;;  %v211_v10 = vsel %vm196_vm0, %v896_v3, 0.0  ;;  %v262_v11 = vmul.f32 %v896_v3, %v896_v3  ;;  %s551_s21 = sshll.u32 %s741_s12, 9  ;;  %s177_s6 = scalar_lea.vmem [#allocation5], %s543_s29 }
  0x3b   : > { %416 = vperm.xlu0 %616, %v373_v1   ;;  %v188_v5 = vcombine.high %v894_v2, %v894_v2  ;;  %v261_v6 = vmul.f32 %v894_v2, %v894_v2  ;;  %v197_v7 = vsel %vm196_vm0, %v894_v2, 0.0  ;;  %v190_v12 = vcombine.high %v898_v4, %v898_v4  ;;  %s451_s7 = sshll.u32 %s177_s6, 4  ;;  %s978_s16 = scalar_lea.hbm %s1029_s2, %s551_s21  ;;  %s980_s7 = int_to_ptr.vmem [resolvable:$true] %s451_s7 }
  0x3c   : > { %v198_v13 = vrot.slane %v197_v7, 4  ;;  %v263_v15 = vmul.f32 %v898_v4, %v898_v4  ;;  %v191_v17 = vcombine.high %v906_v8, %v906_v8  ;;  %v212_v18 = vrot.slane %v211_v10, 4  ;;  %s435_s12 = scalar_lea.sflag [#allocation4], %s881_s28  ;;  %s667_s18 = scalar_lea.vmem %s980_s7, 512 }
  0x3d   : > { %v204_v14 = vsel %vm196_vm0, %v188_v5, 0.0  ;;  %v269_v16 = vcombine.high %v261_v6, %v261_v6  ;;  %v218_v19 = vsel %vm196_vm0, %v189_v9, 0.0  ;;  %v225_v20 = vsel %vm196_vm0, %v898_v4, 0.0  ;;  %p668_p8 = scmp.ne.s32.totalorder %s980_s7, %s667_s18  ;;  %p1038_p9 = scmp.ne.s32.totalorder %s1033_s22, 0 }
  0x3e   : > { %v264_v21 = vmul.f32 %v906_v8, %v906_v8  ;;  %v270_v22 = vcombine.high %v262_v11, %v262_v11  ;;  %v205_v23 = vrot.slane %v204_v14, 4  ;;  %v239_v24 = vsel %vm196_vm0, %v906_v8, 0.0  ;;  %s754_s19 = smov [#allocation5]  }
  0x3f   : > { %v277_v25 = vsel %vm196_vm0, %v261_v6, 0.0  ;;  %v199_v26 = vadd.f32 %v198_v13, %v197_v7  ;;  %v232_v27 = vsel %vm196_vm0, %v190_v12, 0.0  ;;  %v271_v28 = vcombine.high %v263_v15, %v263_v15  ;;  %p669_p11 = pnand %p668_p8, %p1038_p9  ;;  %s671_s20 = sshll.u32 %s754_s19, 4  ;;  %s672_s20 = int_to_ptr.vmem [resolvable:$false] %s671_s20 }
  0x40   : > { %v284_v29 = vsel %vm196_vm0, %v269_v16, 0.0  ;;  %v213_v30 = vadd.f32 %v212_v18, %v211_v10  ;;  %v219_v31 = vrot.slane %v218_v19, 4  ;;  %v226_v32 = vrot.slane %v225_v20, 4  ;;  %s673_s25 = scalar_lea.vmem %s672_s20, 1024  ;;  %p674_p7 = scmp.lt.s32.totalorder %s980_s7, %s672_s20 }
  0x41   : > { %v291_v33 = vsel %vm196_vm0, %v262_v11, 0.0  ;;  %v246_v34 = vsel %vm196_vm0, %v191_v17, 0.0  ;;  %v272_v35 = vcombine.high %v264_v21, %v264_v21  ;;  %v278_v36 = vrot.slane %v277_v25, 4  ;;  %p670_p0 = pneg %p669_p11  ;;  %p675_p13 = scmp.lt.s32.totalorder %s673_s25, %s667_s18 }
  0x42   : > { %v298_v37 = vsel %vm196_vm0, %v270_v22, 0.0  ;;  %v206_v38 = vadd.f32 %v205_v23, %v204_v14  ;;  %v233_v39 = vrot.slane %v232_v27, 4  ;;  %v285_v40 = vrot.slane %v284_v29, 4 }
  0x43   : > { %v305_v41 = vsel %vm196_vm0, %v263_v15, 0.0  ;;  %v200_v42 = vrot.slane %v199_v26, 2  ;;  %v240_v43 = vrot.slane %v239_v24, 4  ;;  %v292_v44 = vrot.slane %v291_v33, 4  ;;  %p676_p3 = por %p675_p13, %p674_p7 }
  0x44   : > { %v312_v45 = vsel %vm196_vm0, %v271_v28, 0.0  ;;  %v220_v46 = vadd.f32 %v219_v31, %v218_v19  ;;  %v247_v47 = vrot.slane %v246_v34, 4  ;;  %v299_v48 = vrot.slane %v298_v37, 4 }
  0x45   : > { %v319_v49 = vsel %vm196_vm0, %v264_v21, 0.0  ;;  %v227_v50 = vadd.f32 %v226_v32, %v225_v20  ;;  %v279_v51 = vadd.f32 %v278_v36, %v277_v25  ;;  %v306_v52 = vrot.slane %v305_v41, 4  ;;  %p677_p6 = pnand %p676_p3, %p670_p0 }
  0x46   : > { %v326_v53 = vsel %vm196_vm0, %v272_v35, 0.0  ;;  %v207_v54 = vrot.slane %v206_v38, 2  ;;  %v234_v55 = vadd.f32 %v233_v39, %v232_v27  ;;  %v286_v56 = vadd.f32 %v285_v40, %v284_v29 }
  0x47   : > { %v313_v57 = vrot.slane %v312_v45, 4  ;;  %v214_v58 = vrot.slane %v213_v30, 2  ;;  %v241_v59 = vadd.f32 %v240_v43, %v239_v24  ;;  %v293_v60 = vadd.f32 %v292_v44, %v291_v33 }
  0x48   : > { %v320_v61 = vrot.slane %v319_v49, 4  ;;  %v221_v62 = vrot.slane %v220_v46, 2  ;;  %v248_v63 = vadd.f32 %v247_v47, %v246_v34  ;;  %v300_v0 = vadd.f32 %v299_v48, %v298_v37 }
  0x49   : > { %v327_v1 = vrot.slane %v326_v53, 4  ;;  %v201_v5 = vadd.f32 %v200_v42, %v199_v26  ;;  %v228_v6 = vrot.slane %v227_v50, 2  ;;  %v280_v7 = vrot.slane %v279_v51, 2 }
  0x4a   : > { %v307_v9 = vadd.f32 %v306_v52, %v305_v41  ;;  %v208_v10 = vadd.f32 %v207_v54, %v206_v38  ;;  %v235_v11 = vrot.slane %v234_v55, 2  ;;  %v287_v12 = vrot.slane %v286_v56, 2 }
  0x4b   : > { %v314_v13 = vadd.f32 %v313_v57, %v312_v45  ;;  %v215_v14 = vadd.f32 %v214_v58, %v213_v30  ;;  %v242_v15 = vrot.slane %v241_v59, 2  ;;  %v294_v16 = vrot.slane %v293_v60, 2 }
  0x4c   : > { %v321_v17 = vadd.f32 %v320_v61, %v319_v49  ;;  %v222_v18 = vadd.f32 %v221_v62, %v220_v46  ;;  %v249_v19 = vrot.slane %v248_v63, 2  ;;  %v301_v20 = vrot.slane %v300_v0, 2 }
  0x4d   : > { %v328_v21 = vadd.f32 %v327_v1, %v326_v53  ;;  %v202_v22 = vrot.slane %v201_v5, 1  ;;  %v229_v23 = vadd.f32 %v228_v6, %v227_v50  ;;  %v281_v24 = vadd.f32 %v280_v7, %v279_v51 }
  0x4e   : > { %v308_v25 = vrot.slane %v307_v9, 2  ;;  %v209_v26 = vrot.slane %v208_v10, 1  ;;  %v236_v27 = vadd.f32 %v235_v11, %v234_v55  ;;  %v288_v28 = vadd.f32 %v287_v12, %v286_v56 }
  0x4f   : > { %v315_v29 = vrot.slane %v314_v13, 2  ;;  %v216_v31 = vrot.slane %v215_v14, 1  ;;  %v243_v32 = vadd.f32 %v242_v15, %v241_v59  ;;  %v295_v33 = vadd.f32 %v294_v16, %v293_v60 }
  0x50   : > { %v322_v34 = vrot.slane %v321_v17, 2  ;;  %v223_v30 = vrot.slane %v222_v18, 1  ;;  %v250_v35 = vadd.f32 %v249_v19, %v248_v63  ;;  %v302_v36 = vadd.f32 %v301_v20, %v300_v0 }
  0x51   : > { %v329_v37 = vrot.slane %v328_v21, 2  ;;  %v203_v38 = vadd.f32 %v202_v22, %v201_v5  ;;  %v230_v39 = vrot.slane %v229_v23, 1  ;;  %v282_v40 = vrot.slane %v281_v24, 1 }
  0x52   : > { %v309_v41 = vadd.f32 %v308_v25, %v307_v9  ;;  %v210_v42 = vadd.f32 %v209_v26, %v208_v10  ;;  %v237_v43 = vrot.slane %v236_v27, 1  ;;  %v289_v44 = vrot.slane %v288_v28, 1 }
  0x53   : > { %v316_v45 = vadd.f32 %v315_v29, %v314_v13  ;;  %v217_v46 = vadd.f32 %v216_v31, %v215_v14  ;;  %v244_v47 = vrot.slane %v243_v32, 1  ;;  %v296_v48 = vrot.slane %v295_v33, 1 }
  0x54   : > { %v323_v49 = vadd.f32 %v322_v34, %v321_v17  ;;  %v224_v50 = vadd.f32 %v223_v30, %v222_v18  ;;  %v251_v51 = vrot.slane %v250_v35, 1  ;;  %v303_v52 = vrot.slane %v302_v36, 1 }
  0x55   : > { %v330_v53 = vadd.f32 %v329_v37, %v328_v21  ;;  %v231_v54 = vadd.f32 %v230_v39, %v229_v23  ;;  %v938_v55 = vmul.f32 0.25, %v203_v38  ;;  %v283_v56 = vadd.f32 %v282_v40, %v281_v24 }
  0x56   : > { %v310_v57 = vrot.slane %v309_v41, 1  ;;  %v238_v58 = vadd.f32 %v237_v43, %v236_v27  ;;  %v940_v59 = vmul.f32 0.25, %v210_v42  ;;  %v290_v60 = vadd.f32 %v289_v44, %v288_v28 }
  0x57   : > { %v317_v61 = vrot.slane %v316_v45, 1  ;;  %v245_v62 = vadd.f32 %v244_v47, %v243_v32  ;;  %v942_v63 = vmul.f32 0.25, %v217_v46  ;;  %v297_v0 = vadd.f32 %v296_v48, %v295_v33 }
  0x58   : > { %v324_v1 = vrot.slane %v323_v49, 1  ;;  %v252_v5 = vadd.f32 %v251_v51, %v250_v35  ;;  %v944_v6 = vmul.f32 0.25, %v224_v50  ;;  %v304_v7 = vadd.f32 %v303_v52, %v302_v36 }
  0x59   : > { %v331_v9 = vrot.slane %v330_v53, 1  ;;  %v946_v10 = vmul.f32 0.25, %v231_v54  ;;  %v311_v11 = vadd.f32 %v310_v57, %v309_v41  ;;  %v333_v12 = vmul.f32 0.25, %v283_v56 }
  0x5a   : > { %v341_v13 = vmul.f32 %v938_v55, %v938_v55  ;;  %v950_v14 = vmul.f32 0.25, %v238_v58  ;;  %v318_v15 = vadd.f32 %v317_v61, %v316_v45  ;;  %v334_v16 = vmul.f32 0.25, %v290_v60 }
  0x5b   : > { %v342_v17 = vmul.f32 %v940_v59, %v940_v59  ;;  %v259_v18 = vmul.f32 0.25, %v245_v62  ;;  %v325_v19 = vadd.f32 %v324_v1, %v323_v49  ;;  %v335_v20 = vmul.f32 0.25, %v297_v0 }
  0x5c   : > { %v343_v21 = vmul.f32 %v942_v63, %v942_v63  ;;  %v260_v22 = vmul.f32 0.25, %v252_v5  ;;  %v332_v23 = vadd.f32 %v331_v9, %v330_v53  ;;  %v336_v24 = vmul.f32 0.25, %v304_v7 }
  0x5d   : > { %v344_v25 = vmul.f32 %v944_v6, %v944_v6  ;;  %v337_v26 = vmul.f32 0.25, %v311_v11  ;;  %v345_v27 = vmul.f32 %v946_v10, %v946_v10  ;;  %v349_v28 = vsub.f32 %v333_v12, %v341_v13 }
  0x5e   : > { %v338_v29 = vmul.f32 0.25, %v318_v15  ;;  %v346_v31 = vmul.f32 %v950_v14, %v950_v14  ;;  %v350_v32 = vsub.f32 %v334_v16, %v342_v17  ;;  %v339_v33 = vmul.f32 0.25, %v325_v19 }
  0x5f   : > { %v347_v34 = vmul.f32 %v259_v18, %v259_v18  ;;  %v351_v30 = vsub.f32 %v335_v20, %v343_v21  ;;  %v340_v35 = vmul.f32 0.25, %v332_v23  ;;  %v348_v36 = vmul.f32 %v260_v22, %v260_v22 }
  0x60   : > { %v352_v37 = vsub.f32 %v336_v24, %v344_v25  ;;  %v353_v38 = vsub.f32 %v337_v26, %v345_v27  ;;  %v357_v39 = vadd.f32 1e-05, %v349_v28  ;;  %v354_v40 = vsub.f32 %v338_v29, %v346_v31 }
  0x61   : > { %v358_v41 = vadd.f32 1e-05, %v350_v32  ;;  %v355_v42 = vsub.f32 %v339_v33, %v347_v34  ;;  %v359_v43 = vadd.f32 1e-05, %v351_v30  ;;  %v356_v44 = vsub.f32 %v340_v35, %v348_v36 }
  0x62   : > { %v360_v45 = vadd.f32 1e-05, %v352_v37  ;;  %v361_v46 = vadd.f32 1e-05, %v353_v38  ;;  %621 = vrsqrt.f32 %v357_v39  ;;  %v362_v47 = vadd.f32 1e-05, %v354_v40 }
  0x63   : > { %623 = vrsqrt.f32 %v358_v41  ;;  %v363_v48 = vadd.f32 1e-05, %v355_v42  ;;  %v364_v49 = vadd.f32 1e-05, %v356_v44  ;;  %v753_v56 = vmov 839922192  }
  0x64   : > { %625 = vrsqrt.f32 %v359_v43  ;;  %v419_v57 = vunpack.c.l.s4 %v753_v56  ;;  %v421_v58 = vlaneseq  ;;  %v382_v61 = vcombine.low %v938_v55, %v940_v59 }
  0x65   : > { %627 = vrsqrt.f32 %v360_v45  ;;  %v383_v62 = vcombine.low %v942_v63, %v944_v6  ;;  %v384_v0 = vcombine.low %v946_v10, %v950_v14  ;;  %v385_v1 = vcombine.low %v259_v18, %v260_v22 }
  0x66   : > { %629 = vrsqrt.f32 %v361_v46  ;;  %v420_v9 = vunpack.c.0.s8 %v419_v57  ;;  %v422_v11 = vshrl.u32 %v421_v58, 7  ;;  %v390_v12 = vsub.f32 %v894_v2, %v382_v61 }
  0x67   : > { %631 = vrsqrt.f32 %v362_v47  ;;  %v391_v13 = vsub.f32 %v896_v3, %v383_v62  ;;  %v392_v15 = vsub.f32 %v898_v4, %v384_v0  ;;  %v393_v55 = vsub.f32 %v906_v8, %v385_v1 }
  0x68   : > { %633 = vrsqrt.f32 %v363_v48  ;;  %v423_v10 = vsub.s32 %v420_v9, %v422_v11 }
  0x69   : > { %635 = vrsqrt.f32 %v364_v49 }
  0x6c   : > { %v622_v50 = vpop.eup %621 }
  0x6d   : > { %v624_v51 = vpop.eup %623 }
  0x6e   : > { %v626_v52 = vpop.eup %625  ;;  %v402_v59 = vcombine.low %v622_v50, %v624_v51 }
  0x6f   : > { %v628_v53 = vpop.eup %627 }
  0x70   : > { %v630_v54 = vpop.eup %629  ;;  %v403_v63 = vcombine.low %v626_v52, %v628_v53  ;;  %v410_v14 = vmul.f32 %v402_v59, %v390_v12 }
  0x71   : > { %v632_v60 = vpop.eup %631 }
  0x72   : > { %v634_v5 = vpop.eup %633  ;;  %v404_v6 = vcombine.low %v630_v54, %v632_v60  ;;  %v411_v17 = vmul.f32 %v403_v63, %v391_v13 }
  0x73   : > { %v636_v7 = vpop.eup %635 }
  0x74   : > { %v405_v16 = vcombine.low %v634_v5, %v636_v7  ;;  %v412_v18 = vmul.f32 %v404_v6, %v392_v15 }
  0x76   : > { %v413_v19 = vmul.f32 %v405_v16, %v393_v55 }
  0xba   : > { %v417_v20 = vpop.permute.xlu0 %416 }
  0xbb   : > { %v424_v2 = vrot.slane %v417_v20, %v423_v10 }
  0xbd   : > { %v426_v3 = vmul.f32 %v424_v2, %v410_v14  ;;  %v427_v4 = vmul.f32 %v424_v2, %v411_v17  ;;  %v428_v8 = vmul.f32 %v424_v2, %v412_v18  ;;  %v429_v21 = vmul.f32 %v424_v2, %v413_v19 }
  0xbf   : > { %430 = vst [vmem:[%s177_s6] sm:$0xff] %v426_v3  ;;  %431 = vst [vmem:[%s177_s6 + $0x8] sm:$0xff] %v427_v4 }
  0xc0   : > { %432 = vst [vmem:[%s177_s6 + $0x10] sm:$0xff] %v428_v8  ;;  %433 = vst [vmem:[%s177_s6 + $0x18] sm:$0xff] %v429_v21 }
  0xc1   : > { %680 = shalt.err (!%p677_p6)
}
  0xc2   : > { %s681_s26 = scalar_lea.hbm %s978_s16, 512  ;;  %s685_s29 = scalar_lea.hbm %s1029_s2, 1024 }
  0xc3   : > { %p682_p4 = scmp.ne.s32.totalorder %s978_s16, %s681_s26  ;;  %p686_p1 = scmp.lt.u32.totalorder %s978_s16, %s1029_s2 }
  0xc4   : > { %p687_p2 = scmp.lt.u32.totalorder %s685_s29, %s681_s26  ;;  %p689_p8 = scmp.lt.u32.totalorder %s681_s26, %s978_s16 }
  0xc5   : > { %p683_p10 = pnand %p682_p4, %p1038_p9 }
  0xc6   : > { %p688_p5 = por %p687_p2, %p686_p1 }
  0xc7   : > { %p684_p12 = pneg %p683_p10 }
  0xc8   : > { %p690_p11 = por %p689_p8, %p688_p5 }
  0xca   : > { %p691_p0 = pnand %p690_p11, %p684_p12 }
  0xcc   : > { %694 = shalt.err (!%p691_p0)
}
  0xcd   : > { %554 = dma.vmem_to_hbm [thread:$0]  (%p1038_p9), %s980_s7, 512, %s978_s16, %s435_s12  }
  0xce PF: > { %s463_s30 = sand.u32 1, %s729_s9   ;;  %p1039_p7 = scmp.ne.s32.totalorder %s1034_s24, 0 }
  0xcf   : > { %p1040_p13 = scmp.ge.s32.totalorder %s749_s14, 2  ;;  %s464_s4 = scalar_lea.sflag [#allocation4], %s463_s30 }
  0xd1   : > { %p561_p3 = pnand %p1040_p13, %p1039_p7 }
  0xd3   : > { %724 = dma.done.wait (!%p561_p3), %s464_s4, 512  }
  0xd4   : > { %726 = vsyncadd (!%p561_p3), %s464_s4, 4294966784  ;;  %s18_s14 = sadd.s32 1, %s749_s14   ;;  %s1041_s9 = smov %s733_s10 }
  0xd5   : > { %p15_p6 = scmp.ge.s32.totalorder %s18_s14, 4   ;;  %s1042_s10 = smov %s737_s11 }
  0xd6   : > { %s1043_s11 = smov %s826_s23  ;;  %s1044_s12 = smov %s745_s13 }
  0xd7   : > { %s1045_s13 = smov %s1047_s17  ;;  %17 = sbr.rel (!%p15_p6) target bundleno = 6 (0x6), region = 73 }
  0xde   :  { %469 = vsyncpa [#allocation3], 1 }
  0xdf   :  { %471 = vsyncpa [#allocation3 + $0x1], 1 }
  0xe0   :  { %472 = vsyncpa [#allocation4], 1 }
  0xe1   :  { %474 = vsyncpa [#allocation4 + $0x1], 1 }

</bundles_post_ra>
